<compile_context>
chip_gen: v6e
topology: v6e:2x2x1
jax: 0.10.0
libtpu: 0.0.40
codegen_flags: <defaults>
</compile_context>

<pallas_src>
import math
from functools import partial

import jax
import jax.numpy as jnp
from jax import lax
from jax.experimental import pallas as pl
from jax.experimental.pallas import tpu as pltpu


def _box_offset_intersection_kernel(emb_ref, w1_ref, b1_ref, w2_ref, b2_ref,
                                    out_ref, acc_sum, acc_min,
                                    *, n_conj, compute_dtype):
    """Grid = (batch_tiles, n_conj). The conjunct axis is the trailing
    'arbitrary' reduction axis; acc_sum (f32) / acc_min (input dtype) live in
    VMEM scratch across it and the output is written once on the last step."""
    k = pl.program_id(1)
    dn = (((1,), (1,)), ((), ()))          # contract last dims == x @ W.T

    @pl.when(k == 0)
    def _init():
        acc_sum[...] = jnp.zeros_like(acc_sum)
        acc_min[...] = jnp.full_like(acc_min, jnp.inf)

    e = emb_ref[0]                                         # (tb, D), input dtype
    h = lax.dot_general(e.astype(compute_dtype), w1_ref[...], dn,
                        preferred_element_type=jnp.float32)
    h = jnp.maximum(h + b1_ref[...], 0.0)                  # bias + relu in f32
    acc_sum[...] = acc_sum[...] + h
    acc_min[...] = jnp.minimum(acc_min[...], e)            # min at input precision

    @pl.when(k == n_conj - 1)
    def _finalize():
        mean = acc_sum[...] * (1.0 / n_conj)               # multiply, no divide
        gate = jax.nn.sigmoid(
            lax.dot_general(mean.astype(compute_dtype), w2_ref[...], dn,
                            preferred_element_type=jnp.float32) + b2_ref[...])
        out_ref[...] = (acc_min[...].astype(jnp.float32) * gate).astype(out_ref.dtype)


def _round_up(x, m):
    return (x + m - 1) // m * m


def _physical_vmem_bytes():
    try:
        return int(pltpu.get_tpu_info().vmem_capacity_bytes)
    except Exception:
        return 64 << 20        # conservative fallback (v7x per-core VMEM)


def _choose_batch_tile(b, max_tb):
    """Pick (tb, bp): batch tile and (minimally) padded batch, bp % tb == 0."""
    max_tb = max(8, (max_tb // 8) * 8)
    if b <= 8:
        return b, b                          # single full-extent tile, no pad
    b8 = _round_up(b, 8)
    cap = min(max_tb, b8)
    if b8 >= 16:                             # >= 2 grid steps: both v7x TCs busy
        cap = min(cap, max(8, ((b8 // 2) // 8) * 8))
    # Largest multiple-of-8 divisor of b8 that is <= cap (no extra padding).
    tb = 8
    d8 = cap // 8
    while d8 >= 1:
        if (b8 // 8) % d8 == 0:
            tb = d8 * 8
            break
        d8 -= 1
    # If the exact divisor forces a tiny tile, accept modest (<=12.5%) padding.
    if tb < max(64, cap // 4):
        bp_alt = _round_up(b, cap)
        if (bp_alt - b8) * 8 <= b8:
            return cap, bp_alt
    return tb, _round_up(b, tb)


def box_offset_intersection(embeddings, w1, b1, w2, b2, *,
                            compute_dtype=jnp.bfloat16, block_b=None):
    """embeddings: (N, B, D); w1, w2: (D, D) = (out, in); b1, b2: (D,) -> (B, D).

    compute_dtype is the MXU-input dtype (default bf16; accumulation is f32).
    Bias add / relu / mean / sigmoid run in f32; the running min (the value
    that multiplies the gate) is kept at the embeddings' original precision.
    """
    n, b, d = embeddings.shape
    emb_dtype = embeddings.dtype
    out_dtype = emb_dtype
    cd = jnp.dtype(compute_dtype)

    e_sz = jnp.dtype(emb_dtype).itemsize
    o_sz = jnp.dtype(out_dtype).itemsize
    c_sz = cd.itemsize

    # ---- Generation-aware VMEM sizing -------------------------------------
    phys = _physical_vmem_bytes()
    budget = int(phys * 0.75)                               # tile-sizing budget
    cap = (phys - (8 << 20)) if phys <= (64 << 20) else int(phys * 0.8)

    # Per-batch-row bytes: double-buffered (1,tb,D) embedding block,
    # double-buffered (tb,D) output block, f32 sum + input-dtype min scratch,
    # plus ~3 f32-sized temporaries (h / cast operand / gate).
    per_row = d * (2 * e_sz + 2 * o_sz + 4 + e_sz + 12)
    const = 2 * d * d * c_sz + 2 * d * 4                    # resident weights/biases

    max_tb = max(8, (budget - const) // max(per_row, 1))
    max_tb = min(max_tb, 2048)
    if block_b is not None:
        max_tb = min(max_tb, max(8, block_b))
    tb, bp = _choose_batch_tile(b, max_tb)

    need = const + tb * per_row
    vmem_limit = int(min(max(int(1.5 * need), 16 << 20), cap))

    # ---- Operand prep: never copy/cast the big tensor unless the batch must
    # be rounded; D is never padded (ragged lane dims are masked in-kernel).
    emb_in = embeddings
    if bp != b:
        emb_in = jnp.pad(embeddings, ((0, 0), (0, bp - b), (0, 0)))
    w1_c = w1.astype(cd)
    w2_c = w2.astype(cd)
    b1_c = b1.astype(jnp.float32).reshape(1, d)
    b2_c = b2.astype(jnp.float32).reshape(1, d)

    kernel = partial(_box_offset_intersection_kernel, n_conj=n, compute_dtype=cd)

    def build(weight_pipeline_mode):
        wkw = ({} if weight_pipeline_mode is None
               else {"pipeline_mode": weight_pipeline_mode})
        grid_spec = pltpu.PrefetchScalarGridSpec(
            num_scalar_prefetch=0,
            grid=(bp // tb, n),                 # (parallel batch, arbitrary conjunct)
            in_specs=[
                pl.BlockSpec((1, tb, d), lambda i, k: (k, i, 0)),
                pl.BlockSpec((d, d), lambda i, k: (0, 0), **wkw),
                pl.BlockSpec((1, d), lambda i, k: (0, 0), **wkw),
                pl.BlockSpec((d, d), lambda i, k: (0, 0), **wkw),
                pl.BlockSpec((1, d), lambda i, k: (0, 0), **wkw),
            ],
            out_specs=pl.BlockSpec((tb, d), lambda i, k: (i, 0)),
            scratch_shapes=[
                pltpu.VMEM((tb, d), jnp.float32),   # running sum of relu(layer1)
                pltpu.VMEM((tb, d), emb_dtype),     # running min of embeddings
            ],
        )
        return pl.pallas_call(
            kernel,
            out_shape=jax.ShapeDtypeStruct((bp, d), out_dtype),
            grid_spec=grid_spec,
            compiler_params=pltpu.CompilerParams(
                dimension_semantics=("parallel", "arbitrary"),
                vmem_limit_bytes=vmem_limit),
        )

    try:
        # Weights/biases have constant index maps -> request a single buffer.
        out = build(pl.Buffered(1))(emb_in, w1_c, b1_c, w2_c, b2_c)
    except Exception:
        # Fallback if single-buffering is not supported by this jax build.
        out = build(None)(emb_in, w1_c, b1_c, w2_c, b2_c)

    if bp != b:
        out = out[:b]
    return out


def _xavier_uniform(key, shape):
    fan_out, fan_in = shape
    bound = math.sqrt(6.0 / (fan_in + fan_out))
    return jax.random.uniform(key, shape, jnp.float32, -bound, bound)


def _linear_bias(key, fan_in, dim):
    bound = 1.0 / math.sqrt(fan_in)
    return jax.random.uniform(key, (dim,), jnp.float32, -bound, bound)


if __name__ == "__main__":
    N, B, D = 4, 8, 32  # num_conjuncts, batch, hidden dim

    key = jax.random.PRNGKey(0)
    k_emb, k_w1, k_b1, k_w2, k_b2 = jax.random.split(key, 5)

    embeddings = jax.random.normal(k_emb, (N, B, D), jnp.float32)
    w1 = _xavier_uniform(k_w1, (D, D))
    b1 = _linear_bias(k_b1, D, D)
    w2 = _xavier_uniform(k_w2, (D, D))
    b2 = _linear_bias(k_b2, D, D)

    # Pure-JAX reference (matches the PyTorch forward).
    h_ref = jax.nn.relu(jnp.einsum("nbd,ed->nbe", embeddings, w1) + b1)
    gate_ref = jax.nn.sigmoid(jnp.einsum("bd,ed->be", h_ref.mean(0), w2) + b2)
    ref = jnp.min(embeddings, axis=0) * gate_ref

    # f32 MXU-input path: tight tolerance.
    out_f32 = jax.block_until_ready(
        box_offset_intersection(embeddings, w1, b1, w2, b2,
                                compute_dtype=jnp.float32))
    assert out_f32.shape == (B, D)
    assert out_f32.dtype == embeddings.dtype
    assert jnp.allclose(out_f32, ref, atol=1e-4, rtol=1e-4)

    # Default path: bf16 MXU inputs, f32 accumulation, f32 min/offset.
    out_bf16 = jax.block_until_ready(
        box_offset_intersection(embeddings, w1, b1, w2, b2))
    assert out_bf16.shape == (B, D)
    assert jnp.allclose(out_bf16, ref, atol=5e-2, rtol=5e-2)

    print("KERNEL_OK")
</pallas_src>

<mosaic_0001>
module attributes {stable_mosaic.version = 11 : i64} {
  func.func @_box_offset_intersection_kernel(%arg0: i32, %arg1: i32, %arg2: memref<1x8x32xf32, #tpu.memory_space<vmem>>, %arg3: memref<32x32xf32, #tpu.memory_space<vmem>>, %arg4: memref<1x32xf32, #tpu.memory_space<vmem>>, %arg5: memref<32x32xf32, #tpu.memory_space<vmem>>, %arg6: memref<1x32xf32, #tpu.memory_space<vmem>>, %arg7: memref<8x32xf32, #tpu.memory_space<vmem>>, %arg8: memref<8x32xf32, #tpu.memory_space<vmem>>, %arg9: memref<8x32xf32, #tpu.memory_space<vmem>>) attributes {dimension_semantics = [#tpu.dimension_semantics<parallel>, #tpu.dimension_semantics<arbitrary>], iteration_bounds = array<i64: 1, 4>, scalar_prefetch = 0 : i64, scratch_operands = 2 : i64, tpu.core_type = #tpu.core_type<tc>, window_params = [{transform_indices = @transform_0, window_bounds = array<i64: 1, 8, 32>}, {pipeline_mode = #tpu.pipeline_mode<synchronous>, transform_indices = @transform_1, window_bounds = array<i64: 32, 32>}, {pipeline_mode = #tpu.pipeline_mode<synchronous>, transform_indices = @transform_2, window_bounds = array<i64: 1, 32>}, {pipeline_mode = #tpu.pipeline_mode<synchronous>, transform_indices = @transform_3, window_bounds = array<i64: 32, 32>}, {pipeline_mode = #tpu.pipeline_mode<synchronous>, transform_indices = @transform_4, window_bounds = array<i64: 1, 32>}, {transform_indices = @transform_5, window_bounds = array<i64: 8, 32>}]} {
    %c0_i32 = arith.constant 0 : i32
    %0 = arith.cmpi eq, %arg1, %c0_i32 : i32
    %1 = arith.extui %0 : i1 to i32
    %c0_i32_0 = arith.constant 0 : i32
    %2 = arith.cmpi ne, %1, %c0_i32_0 : i32
    scf.if %2 {
      %cst_17 = arith.constant 0.000000e+00 : f32
      %21 = vector.broadcast %cst_17 : f32 to vector<8x32xf32>
      %c0_18 = arith.constant 0 : index
      %c0_19 = arith.constant 0 : index
      %22 = vector.load %arg8[%c0_18, %c0_19] : memref<8x32xf32, #tpu.memory_space<vmem>>, vector<8x32xf32>
      tpu.vector_store %arg8[%c0_18, %c0_19], %21 {strides = array<i32>} : memref<8x32xf32, #tpu.memory_space<vmem>>, vector<8x32xf32>,
      %cst_20 = arith.constant 0x7F800000 : f32
      %23 = vector.broadcast %cst_20 : f32 to vector<8x32xf32>
      %c0_21 = arith.constant 0 : index
      %c0_22 = arith.constant 0 : index
      %24 = vector.load %arg9[%c0_21, %c0_22] : memref<8x32xf32, #tpu.memory_space<vmem>>, vector<8x32xf32>
      tpu.vector_store %arg9[%c0_21, %c0_22], %23 {strides = array<i32>} : memref<8x32xf32, #tpu.memory_space<vmem>>, vector<8x32xf32>,
    } else {
    }
    %c0 = arith.constant 0 : index
    %c0_1 = arith.constant 0 : index
    %c0_2 = arith.constant 0 : index
    %3 = vector.load %arg2[%c0, %c0_1, %c0_2] : memref<1x8x32xf32, #tpu.memory_space<vmem>>, vector<1x8x32xf32>
    %4 = vector.shape_cast %3 : vector<1x8x32xf32> to vector<8x32xf32>
    %c0_3 = arith.constant 0 : index
    %c0_4 = arith.constant 0 : index
    %5 = vector.load %arg3[%c0_3, %c0_4] : memref<32x32xf32, #tpu.memory_space<vmem>>, vector<32x32xf32>
    %cst = arith.constant dense<0.000000e+00> : vector<8x32xf32>
    %6 = tpu.matmul %4, %5, %cst {dimension_numbers = #tpu.dot_dimension_numbers<[1], [1], [0], [0], [0, 0, 1, 0], [], []>} : vector<8x32xf32>, vector<32x32xf32>, vector<8x32xf32> -> vector<8x32xf32>
    %c0_5 = arith.constant 0 : index
    %c0_6 = arith.constant 0 : index
    %7 = vector.load %arg4[%c0_5, %c0_6] : memref<1x32xf32, #tpu.memory_space<vmem>>, vector<1x32xf32>
    %8 = vector.broadcast %7 : vector<1x32xf32> to vector<8x32xf32>
    %9 = arith.addf %6, %8 : vector<8x32xf32>
    %cst_7 = arith.constant 0.000000e+00 : f32
    %10 = vector.broadcast %cst_7 : f32 to vector<8x32xf32>
    %11 = arith.maximumf %9, %10 : vector<8x32xf32>
    %c0_8 = arith.constant 0 : index
    %c0_9 = arith.constant 0 : index
    %12 = vector.load %arg8[%c0_8, %c0_9] : memref<8x32xf32, #tpu.memory_space<vmem>>, vector<8x32xf32>
    %13 = arith.addf %12, %11 : vector<8x32xf32>
    %c0_10 = arith.constant 0 : index
    %c0_11 = arith.constant 0 : index
    %14 = vector.load %arg8[%c0_10, %c0_11] : memref<8x32xf32, #tpu.memory_space<vmem>>, vector<8x32xf32>
    tpu.vector_store %arg8[%c0_10, %c0_11], %13 {strides = array<i32>} : memref<8x32xf32, #tpu.memory_space<vmem>>, vector<8x32xf32>,
    %c0_12 = arith.constant 0 : index
    %c0_13 = arith.constant 0 : index
    %15 = vector.load %arg9[%c0_12, %c0_13] : memref<8x32xf32, #tpu.memory_space<vmem>>, vector<8x32xf32>
    %16 = arith.minimumf %15, %4 : vector<8x32xf32>
    %c0_14 = arith.constant 0 : index
    %c0_15 = arith.constant 0 : index
    %17 = vector.load %arg9[%c0_14, %c0_15] : memref<8x32xf32, #tpu.memory_space<vmem>>, vector<8x32xf32>
    tpu.vector_store %arg9[%c0_14, %c0_15], %16 {strides = array<i32>} : memref<8x32xf32, #tpu.memory_space<vmem>>, vector<8x32xf32>,
    %c3_i32 = arith.constant 3 : i32
    %18 = arith.cmpi eq, %arg1, %c3_i32 : i32
    %19 = arith.extui %18 : i1 to i32
    %c0_i32_16 = arith.constant 0 : i32
    %20 = arith.cmpi ne, %19, %c0_i32_16 : i32
    scf.if %20 {
      %c0_17 = arith.constant 0 : index
      %c0_18 = arith.constant 0 : index
      %21 = vector.load %arg8[%c0_17, %c0_18] : memref<8x32xf32, #tpu.memory_space<vmem>>, vector<8x32xf32>
      %cst_19 = arith.constant 2.500000e-01 : f32
      %22 = vector.broadcast %cst_19 : f32 to vector<8x32xf32>
      %23 = arith.mulf %21, %22 : vector<8x32xf32>
      %c0_20 = arith.constant 0 : index
      %c0_21 = arith.constant 0 : index
      %24 = vector.load %arg5[%c0_20, %c0_21] : memref<32x32xf32, #tpu.memory_space<vmem>>, vector<32x32xf32>
      %cst_22 = arith.constant dense<0.000000e+00> : vector<8x32xf32>
      %25 = tpu.matmul %23, %24, %cst_22 {dimension_numbers = #tpu.dot_dimension_numbers<[1], [1], [0], [0], [0, 0, 1, 0], [], []>} : vector<8x32xf32>, vector<32x32xf32>, vector<8x32xf32> -> vector<8x32xf32>
      %c0_23 = arith.constant 0 : index
      %c0_24 = arith.constant 0 : index
      %26 = vector.load %arg6[%c0_23, %c0_24] : memref<1x32xf32, #tpu.memory_space<vmem>>, vector<1x32xf32>
      %27 = vector.broadcast %26 : vector<1x32xf32> to vector<8x32xf32>
      %28 = arith.addf %25, %27 : vector<8x32xf32>
      %29 = arith.negf %28 : vector<8x32xf32>
      %30 = math.exp %29 : vector<8x32xf32>
      %cst_25 = arith.constant 1.000000e+00 : f32
      %31 = vector.broadcast %cst_25 : f32 to vector<8x32xf32>
      %32 = arith.addf %31, %30 : vector<8x32xf32>
      %33 = arith.divf %31, %32 : vector<8x32xf32>
      %c0_26 = arith.constant 0 : index
      %c0_27 = arith.constant 0 : index
      %34 = vector.load %arg9[%c0_26, %c0_27] : memref<8x32xf32, #tpu.memory_space<vmem>>, vector<8x32xf32>
      %35 = arith.mulf %34, %33 : vector<8x32xf32>
      %c0_28 = arith.constant 0 : index
      %c0_29 = arith.constant 0 : index
      %36 = vector.load %arg7[%c0_28, %c0_29] : memref<8x32xf32, #tpu.memory_space<vmem>>, vector<8x32xf32>
      tpu.vector_store %arg7[%c0_28, %c0_29], %35 {strides = array<i32>} : memref<8x32xf32, #tpu.memory_space<vmem>>, vector<8x32xf32>,
    } else {
    }
    return
  }
  func.func @transform_0(%arg0: i32, %arg1: i32) -> (i32, i32, i32) {
    %c0_i32 = arith.constant 0 : i32
    %c0_i32_0 = arith.constant 0 : i32
    return %arg1, %arg0, %c0_i32 : i32, i32, i32
  }
  func.func @transform_1(%arg0: i32, %arg1: i32) -> (i32, i32) {
    %c0_i32 = arith.constant 0 : i32
    %c0_i32_0 = arith.constant 0 : i32
    %c0_i32_1 = arith.constant 0 : i32
    return %c0_i32, %c0_i32_0 : i32, i32
  }
  func.func @transform_2(%arg0: i32, %arg1: i32) -> (i32, i32) {
    %c0_i32 = arith.constant 0 : i32
    %c0_i32_0 = arith.constant 0 : i32
    %c0_i32_1 = arith.constant 0 : i32
    return %c0_i32, %c0_i32_0 : i32, i32
  }
  func.func @transform_3(%arg0: i32, %arg1: i32) -> (i32, i32) {
    %c0_i32 = arith.constant 0 : i32
    %c0_i32_0 = arith.constant 0 : i32
    %c0_i32_1 = arith.constant 0 : i32
    return %c0_i32, %c0_i32_0 : i32, i32
  }
  func.func @transform_4(%arg0: i32, %arg1: i32) -> (i32, i32) {
    %c0_i32 = arith.constant 0 : i32
    %c0_i32_0 = arith.constant 0 : i32
    %c0_i32_1 = arith.constant 0 : i32
    return %c0_i32, %c0_i32_0 : i32, i32
  }
  func.func @transform_5(%arg0: i32, %arg1: i32) -> (i32, i32) {
    %c0_i32 = arith.constant 0 : i32
    %c0_i32_0 = arith.constant 0 : i32
    return %arg0, %c0_i32 : i32, i32
  }
}

module attributes {stable_mosaic.version = 11 : i64} {
  func.func @_box_offset_intersection_kernel(%arg0: i32, %arg1: i32, %arg2: memref<1x8x32xf32, #tpu.memory_space<vmem>>, %arg3: memref<32x32xf32, #tpu.memory_space<vmem>>, %arg4: memref<1x32xf32, #tpu.memory_space<vmem>>, %arg5: memref<32x32xf32, #tpu.memory_space<vmem>>, %arg6: memref<1x32xf32, #tpu.memory_space<vmem>>, %arg7: memref<8x32xf32, #tpu.memory_space<vmem>>, %arg8: memref<8x32xf32, #tpu.memory_space<vmem>>, %arg9: memref<8x32xf32, #tpu.memory_space<vmem>>) attributes {dimension_semantics = [#tpu.dimension_semantics<parallel>, #tpu.dimension_semantics<arbitrary>], iteration_bounds = array<i64: 1, 4>, scalar_prefetch = 0 : i64, scratch_operands = 2 : i64, tpu.core_type = #tpu.core_type<tc>, window_params = [{transform_indices = @transform_0, window_bounds = array<i64: 1, 8, 32>}, {pipeline_mode = #tpu.pipeline_mode<synchronous>, transform_indices = @transform_1, window_bounds = array<i64: 32, 32>}, {pipeline_mode = #tpu.pipeline_mode<synchronous>, transform_indices = @transform_2, window_bounds = array<i64: 1, 32>}, {pipeline_mode = #tpu.pipeline_mode<synchronous>, transform_indices = @transform_3, window_bounds = array<i64: 32, 32>}, {pipeline_mode = #tpu.pipeline_mode<synchronous>, transform_indices = @transform_4, window_bounds = array<i64: 1, 32>}, {transform_indices = @transform_5, window_bounds = array<i64: 8, 32>}]} {
    %c0_i32 = arith.constant 0 : i32
    %0 = arith.cmpi eq, %arg1, %c0_i32 : i32
    %1 = arith.extui %0 : i1 to i32
    %c0_i32_0 = arith.constant 0 : i32
    %2 = arith.cmpi ne, %1, %c0_i32_0 : i32
    scf.if %2 {
      %cst_17 = arith.constant 0.000000e+00 : f32
      %21 = vector.broadcast %cst_17 : f32 to vector<8x32xf32>
      %c0_18 = arith.constant 0 : index
      %c0_19 = arith.constant 0 : index
      %22 = vector.load %arg8[%c0_18, %c0_19] : memref<8x32xf32, #tpu.memory_space<vmem>>, vector<8x32xf32>
      tpu.vector_store %arg8[%c0_18, %c0_19], %21 {strides = array<i32>} : memref<8x32xf32, #tpu.memory_space<vmem>>, vector<8x32xf32>,
      %cst_20 = arith.constant 0x7F800000 : f32
      %23 = vector.broadcast %cst_20 : f32 to vector<8x32xf32>
      %c0_21 = arith.constant 0 : index
      %c0_22 = arith.constant 0 : index
      %24 = vector.load %arg9[%c0_21, %c0_22] : memref<8x32xf32, #tpu.memory_space<vmem>>, vector<8x32xf32>
      tpu.vector_store %arg9[%c0_21, %c0_22], %23 {strides = array<i32>} : memref<8x32xf32, #tpu.memory_space<vmem>>, vector<8x32xf32>,
    } else {
    }
    %c0 = arith.constant 0 : index
    %c0_1 = arith.constant 0 : index
    %c0_2 = arith.constant 0 : index
    %3 = vector.load %arg2[%c0, %c0_1, %c0_2] : memref<1x8x32xf32, #tpu.memory_space<vmem>>, vector<1x8x32xf32>
    %4 = vector.shape_cast %3 : vector<1x8x32xf32> to vector<8x32xf32>
    %c0_3 = arith.constant 0 : index
    %c0_4 = arith.constant 0 : index
    %5 = vector.load %arg3[%c0_3, %c0_4] : memref<32x32xf32, #tpu.memory_space<vmem>>, vector<32x32xf32>
    %cst = arith.constant dense<0.000000e+00> : vector<8x32xf32>
    %6 = tpu.matmul %4, %5, %cst {dimension_numbers = #tpu.dot_dimension_numbers<[1], [1], [0], [0], [0, 0, 1, 0], [], []>} : vector<8x32xf32>, vector<32x32xf32>, vector<8x32xf32> -> vector<8x32xf32>
    %c0_5 = arith.constant 0 : index
    %c0_6 = arith.constant 0 : index
    %7 = vector.load %arg4[%c0_5, %c0_6] : memref<1x32xf32, #tpu.memory_space<vmem>>, vector<1x32xf32>
    %8 = vector.broadcast %7 : vector<1x32xf32> to vector<8x32xf32>
    %9 = arith.addf %6, %8 : vector<8x32xf32>
    %cst_7 = arith.constant 0.000000e+00 : f32
    %10 = vector.broadcast %cst_7 : f32 to vector<8x32xf32>
    %11 = arith.maximumf %9, %10 : vector<8x32xf32>
    %c0_8 = arith.constant 0 : index
    %c0_9 = arith.constant 0 : index
    %12 = vector.load %arg8[%c0_8, %c0_9] : memref<8x32xf32, #tpu.memory_space<vmem>>, vector<8x32xf32>
    %13 = arith.addf %12, %11 : vector<8x32xf32>
    %c0_10 = arith.constant 0 : index
    %c0_11 = arith.constant 0 : index
    %14 = vector.load %arg8[%c0_10, %c0_11] : memref<8x32xf32, #tpu.memory_space<vmem>>, vector<8x32xf32>
    tpu.vector_store %arg8[%c0_10, %c0_11], %13 {strides = array<i32>} : memref<8x32xf32, #tpu.memory_space<vmem>>, vector<8x32xf32>,
    %c0_12 = arith.constant 0 : index
    %c0_13 = arith.constant 0 : index
    %15 = vector.load %arg9[%c0_12, %c0_13] : memref<8x32xf32, #tpu.memory_space<vmem>>, vector<8x32xf32>
    %16 = arith.minimumf %15, %4 : vector<8x32xf32>
    %c0_14 = arith.constant 0 : index
    %c0_15 = arith.constant 0 : index
    %17 = vector.load %arg9[%c0_14, %c0_15] : memref<8x32xf32, #tpu.memory_space<vmem>>, vector<8x32xf32>
    tpu.vector_store %arg9[%c0_14, %c0_15], %16 {strides = array<i32>} : memref<8x32xf32, #tpu.memory_space<vmem>>, vector<8x32xf32>,
    %c3_i32 = arith.constant 3 : i32
    %18 = arith.cmpi eq, %arg1, %c3_i32 : i32
    %19 = arith.extui %18 : i1 to i32
    %c0_i32_16 = arith.constant 0 : i32
    %20 = arith.cmpi ne, %19, %c0_i32_16 : i32
    scf.if %20 {
      %c0_17 = arith.constant 0 : index
      %c0_18 = arith.constant 0 : index
      %21 = vector.load %arg8[%c0_17, %c0_18] : memref<8x32xf32, #tpu.memory_space<vmem>>, vector<8x32xf32>
      %cst_19 = arith.constant 2.500000e-01 : f32
      %22 = vector.broadcast %cst_19 : f32 to vector<8x32xf32>
      %23 = arith.mulf %21, %22 : vector<8x32xf32>
      %c0_20 = arith.constant 0 : index
      %c0_21 = arith.constant 0 : index
      %24 = vector.load %arg5[%c0_20, %c0_21] : memref<32x32xf32, #tpu.memory_space<vmem>>, vector<32x32xf32>
      %cst_22 = arith.constant dense<0.000000e+00> : vector<8x32xf32>
      %25 = tpu.matmul %23, %24, %cst_22 {dimension_numbers = #tpu.dot_dimension_numbers<[1], [1], [0], [0], [0, 0, 1, 0], [], []>} : vector<8x32xf32>, vector<32x32xf32>, vector<8x32xf32> -> vector<8x32xf32>
      %c0_23 = arith.constant 0 : index
      %c0_24 = arith.constant 0 : index
      %26 = vector.load %arg6[%c0_23, %c0_24] : memref<1x32xf32, #tpu.memory_space<vmem>>, vector<1x32xf32>
      %27 = vector.broadcast %26 : vector<1x32xf32> to vector<8x32xf32>
      %28 = arith.addf %25, %27 : vector<8x32xf32>
      %29 = arith.negf %28 : vector<8x32xf32>
      %30 = math.exp %29 : vector<8x32xf32>
      %cst_25 = arith.constant 1.000000e+00 : f32
      %31 = vector.broadcast %cst_25 : f32 to vector<8x32xf32>
      %32 = arith.addf %31, %30 : vector<8x32xf32>
      %33 = arith.divf %31, %32 : vector<8x32xf32>
      %c0_26 = arith.constant 0 : index
      %c0_27 = arith.constant 0 : index
      %34 = vector.load %arg9[%c0_26, %c0_27] : memref<8x32xf32, #tpu.memory_space<vmem>>, vector<8x32xf32>
      %35 = arith.mulf %34, %33 : vector<8x32xf32>
      %c0_28 = arith.constant 0 : index
      %c0_29 = arith.constant 0 : index
      %36 = vector.load %arg7[%c0_28, %c0_29] : memref<8x32xf32, #tpu.memory_space<vmem>>, vector<8x32xf32>
      tpu.vector_store %arg7[%c0_28, %c0_29], %35 {strides = array<i32>} : memref<8x32xf32, #tpu.memory_space<vmem>>, vector<8x32xf32>,
    } else {
    }
    return
  }
  func.func @transform_0(%arg0: i32, %arg1: i32) -> (i32, i32, i32) {
    %c0_i32 = arith.constant 0 : i32
    %c0_i32_0 = arith.constant 0 : i32
    return %arg1, %arg0, %c0_i32 : i32, i32, i32
  }
  func.func @transform_1(%arg0: i32, %arg1: i32) -> (i32, i32) {
    %c0_i32 = arith.constant 0 : i32
    %c0_i32_0 = arith.constant 0 : i32
    %c0_i32_1 = arith.constant 0 : i32
    return %c0_i32, %c0_i32_0 : i32, i32
  }
  func.func @transform_2(%arg0: i32, %arg1: i32) -> (i32, i32) {
    %c0_i32 = arith.constant 0 : i32
    %c0_i32_0 = arith.constant 0 : i32
    %c0_i32_1 = arith.constant 0 : i32
    return %c0_i32, %c0_i32_0 : i32, i32
  }
  func.func @transform_3(%arg0: i32, %arg1: i32) -> (i32, i32) {
    %c0_i32 = arith.constant 0 : i32
    %c0_i32_0 = arith.constant 0 : i32
    %c0_i32_1 = arith.constant 0 : i32
    return %c0_i32, %c0_i32_0 : i32, i32
  }
  func.func @transform_4(%arg0: i32, %arg1: i32) -> (i32, i32) {
    %c0_i32 = arith.constant 0 : i32
    %c0_i32_0 = arith.constant 0 : i32
    %c0_i32_1 = arith.constant 0 : i32
    return %c0_i32, %c0_i32_0 : i32, i32
  }
  func.func @transform_5(%arg0: i32, %arg1: i32) -> (i32, i32) {
    %c0_i32 = arith.constant 0 : i32
    %c0_i32_0 = arith.constant 0 : i32
    return %arg0, %c0_i32 : i32, i32
  }
}

</mosaic_0001>

<bundles_post_ra>
// kernel: tpu_custom_call.1
= control target key start
LH: loop header
LB: loop body
LE: loop exit
PB: predicated region body
PF: predicated region fallthrough
CT: control target
= control target key end

     0   :  { %10 = vsyncpa [#allocation5], 0  ;;  %s1122_s0 = inlined_call_operand.hbm [shape: f32[4,8,32], index: 0, kind: input, shape index: {}]   ;;  %s1123_s1 = inlined_call_operand.hbm [shape: f32[32,32], index: 1, kind: input, shape index: {}]   ;;  %s1124_s2 = inlined_call_operand.vmem [shape: f32[1,32], index: 2, kind: input, shape index: {}]   ;;  %s1125_s3 = inlined_call_operand.hbm [shape: f32[32,32], index: 3, kind: input, shape index: {}]   ;;  %s1126_s4 = inlined_call_operand.vmem [shape: f32[1,32], index: 4, kind: input, shape index: {}]   ;;  %s1127_s5 = inlined_call_operand.hbm [shape: f32[8,32], index: 5, kind: output, shape index: {}]  }
   0x1   :  { %12 = vsyncpa [#allocation5 + $0x1], 0 }
   0x2   :  { %13 = vsyncpa [#allocation8], 0 }
   0x3   :  { %14 = vsyncpa [#allocation6], 0  ;;  %s953_s18 = smov 0   ;;  %s955_s19 = smov 0  }
   0x4   :  { %s957_s20 = smov 0   ;;  %s959_s21 = smov 0  }
   0x5   :  { %s961_s22 = smov 0   ;;  %s963_s23 = smov 0  }
   0x6 LB: > { %s590_s24 = sadd.s32 4294967295, %s909_s23   ;;  %p54_p0 = scmp.ne.s32.totalorder %s893_s19, %s889_s18  ;;  %s909_s23 = sphi %s963_s23, %s20_s23   ;;  %s905_s22 = sphi %s961_s22, %s1141_s22   ;;  %s901_s21 = sphi %s959_s21, %s1140_s21   ;;  %s897_s20 = sphi %s957_s20, %s1139_s20   ;;  %s893_s19 = sphi %s955_s19, %s1138_s19   ;;  %s889_s18 = sphi %s953_s18, %s1137_s18  }
   0x7   : > { %p985_p1 = scmp.eq.s32.totalorder %s590_s24, 0  ;;  %p591_p2 = scmp.ge.s32.totalorder %s909_s23, 1 }
   0x8   : > { %p175_p3 = scmp.lt.s32.totalorder %s909_s23, 5  ;;  %s911_s28 = smov [#allocation7]  }
   0x9   : > { %s1130_s25 = scalar_select %p985_p1, 1, 0 }
   0xa   : > { %p993_p4 = por %p985_p1, %p54_p0  ;;  %p997_p5 = pnand %p591_p2, %p175_p3 }
   0xb   : > { %s187_s29 = sshll.u32 %s911_s28, 4  ;;  %s912_s6 = smov [#allocation9]   ;;  %s188_s29 = int_to_ptr.vmem [resolvable:$true] %s187_s29 }
   0xc   : > { %p666_p6 = pneg %p997_p5  ;;  %s203_s7 = sshll.u32 %s912_s6, 4  ;;  %s204_s7 = int_to_ptr.vmem [resolvable:$true] %s203_s7 }
   0xd   : > { %s758_s8 = scalar_lea.vmem %s188_s29, 512  ;;  %p766_p12 = scmp.lt.s32.totalorder %s188_s29, %s188_s29 }
   0xe   : > { %p1005_p7 = pnand %p666_p6, %p985_p1  ;;  %p759_p9 = scmp.ne.s32.totalorder %s188_s29, %s758_s8 }
   0xf   : > { %p767_p13 = scmp.lt.s32.totalorder %s758_s8, %s758_s8 }
  0x10   : > { %p749_p8 = pneg %p1005_p7 }
  0x11   : > { %p768_p0 = por %p767_p13, %p766_p12 }
  0x12   : > { %p761_p10 = pnand %p759_p9, %p749_p8 }
  0x14   : > { %p762_p11 = pneg %p761_p10 }
  0x16   : > { %p769_p2 = pnand %p768_p0, %p762_p11 }
  0x18   : > { %772 = shalt.err (!%p769_p2)
}
  0x19   : > { %s913_s9 = smov 128   ;;  %s914_s10 = smov 8  }
  0x1a   : > { %669 = dma.hbm_to_vmem [thread:$0]  (!%p1005_p7), %s1123_s1, 512, %s188_s29, [#allocation8], %s913_s9, %s913_s9, %s914_s10  }
  0x1b   : > { %s784_s13 = scalar_lea.vmem %s204_s7, 512  ;;  %p792_p10 = scmp.lt.s32.totalorder %s204_s7, %s204_s7 }
  0x1c   : > { %p785_p3 = scmp.ne.s32.totalorder %s204_s7, %s784_s13  ;;  %p793_p1 = scmp.lt.s32.totalorder %s784_s13, %s784_s13 }
  0x1e   : > { %p787_p6 = pnand %p785_p3, %p749_p8  ;;  %p794_p12 = por %p793_p1, %p792_p10 }
  0x20   : > { %p788_p9 = pneg %p787_p6 }
  0x22   : > { %p795_p11 = pnand %p794_p12, %p788_p9 }
  0x24   : > { %798 = shalt.err (!%p795_p11)
}
  0x25   : > { %672 = dma.hbm_to_vmem [thread:$0]  (!%p1005_p7), %s1125_s3, 512, %s204_s7, [#allocation8], %s913_s9, %s913_s9, %s914_s10  }
  0x26   : > { %s29_s16 = sadd.s32 1, %s905_s22  ;;  %s41_s17 = sadd.s32 1, %s897_s20 }
  0x27   : > { %p30_p1 = scmp.ge.s32.totalorder %s29_s16, 4  ;;  %p48_p8 = scmp.ne.s32.totalorder %s897_s20, %s893_s19 }
  0x28   : > { %p49_p13 = scmp.eq.s32.totalorder %s909_s23, 0  ;;  %p679_p0 = scmp.lt.s32.totalorder %s909_s23, 4 }
  0x29   : > { %s1143_s16 = smov (%p30_p1, %s29_s16), 0  ;;  %s220_s18 = sand.u32 1, %s897_s20  }
  0x2a   : > { %p50_p2 = por %p49_p13, %p48_p8  ;;  %s36_s28 = ssub.s32 %s905_s22, %s1143_s16 }
  0x2b   : > { %p39_p3 = scmp.eq.s32.totalorder %s36_s28, 0  ;;  %s595_s29 = sshll.u32 %s220_s18, 3 }
  0x2c   : > { %s596_s30 = sshll.u32 %s905_s22, 7  ;;  %s224_s10 = scalar_lea.vmem [#allocation4], %s595_s29 }
  0x2d   : > { %s1040_s6 = scalar_select %p39_p3, %s897_s20, %s41_s17  }
  0x2e   : > { %s230_s9 = scalar_lea.hbm %s1122_s0, %s596_s30  ;;  %s232_s11 = sshll.u32 %s224_s10, 4  ;;  %s233_s11 = int_to_ptr.vmem [resolvable:$true] %s232_s11 }
  0x2f   : > { %p1047_p7 = pnand %p679_p0, %p50_p2  ;;  %s221_s13 = scalar_lea.sflag [#allocation5], %s220_s18 }
  0x30   : > { %s812_s14 = scalar_lea.vmem %s233_s11, 128  ;;  %s915_s15 = smov [#allocation4]  }
  0x31   : > { %p801_p6 = pneg %p1047_p7  ;;  %p813_p9 = scmp.ne.s32.totalorder %s233_s11, %s812_s14 }
  0x32   : > { %s817_s17 = sshll.u32 %s915_s15, 4  ;;  %s818_s17 = int_to_ptr.vmem [resolvable:$false] %s817_s17 }
  0x33   : > { %p815_p10 = pnand %p813_p9, %p801_p6  ;;  %s819_s28 = scalar_lea.vmem %s818_s17, 256 }
  0x34   : > { %p820_p11 = scmp.lt.s32.totalorder %s233_s11, %s818_s17  ;;  %p821_p1 = scmp.lt.s32.totalorder %s819_s28, %s812_s14 }
  0x35   : > { %p816_p12 = pneg %p815_p10 }
  0x36   : > { %p822_p8 = por %p821_p1, %p820_p11 }
  0x38   : > { %p823_p13 = pnand %p822_p8, %p816_p12 }
  0x3a   : > { %826 = shalt.err (!%p823_p13)
}
  0x3b   : > { %676 = dma.hbm_to_vmem [thread:$0]  (!%p1047_p7), %s230_s9, 128, %s233_s11, %s221_s13  }
  0x3c   : > { %241 = sbr.rel (%p997_p5) target bundleno = 557 (0x22d), region = 40  ;;  %s243_s18 = sand.u32 (!%p997_p5), 1, %s893_s19  }
  0x3d   : > { %s598_s29 = sshll.u32 (!%p997_p5), %s243_s18, 3  ;;  %s244_s30 = scalar_lea.sflag (!%p997_p5), [#allocation5], %s243_s18 }
  0x3e   : > { %s247_s8 = scalar_lea.vmem (!%p997_p5), [#allocation4], %s598_s29 }
  0x41   : > { %876 = dma.done.wait (%p993_p4), %s244_s30, 128  }
  0x42   : > { %878 = vsyncadd (%p993_p4), %s244_s30, 4294967168  ;;  %p1135_p0 = scmp.ne.s32.totalorder %s1130_s25, 0 }
  0x44   : > { %880 = dma.done.wait (%p1135_p0), [#allocation8], 1024  }
  0x45   : > { %882 = vsyncadd (%p1135_p0), [#allocation8], 4294966272  ;;  %p601_p2 = scmp.ne.s32.totalorder %s901_s21, 0 }
  0x47   : > { %280 = sbr.rel (%p601_p2) target bundleno = 78 (0x4e), region = 56 }
  0x4c   : > { %vm281_vm0 = vcmask 261120   ;;  %v916_v0 = vmov 0.0   ;;  %v917_v1 = vmov inf  }
  0x4d   : > { %282 = vst.msk [vmem:[#allocation2] sm:$0xff] %vm281_vm0, %v916_v0  ;;  %283 = vst.msk [vmem:[#allocation3] sm:$0xff] %vm281_vm0, %v917_v1 }
  0x4e PF: > { %v288_v2 = vld [vmem:[#allocation7 + $0x18] sm:$0xff]  ;;  %vm296_vm1 = vcmask 261120   ;;  %v918_v3 = vmov 0.0   ;;  %vm919_vm2 = vmmov 0   ;;  %v287_v7 = vld [vmem:[#allocation7 + $0x10] sm:$0xff]  ;;  %v286_v8 = vld [vmem:[#allocation7 + $0x8] sm:$0xff] }
  0x4f   : > { %630 = vmatprep.subr.mxu0 %v918_v3  ;;  %638 = vmatprep.mubr.msk.f32.mxu0 %vm919_vm2, %v918_v3  ;;  %v284_v4 = vld [vmem:[%s247_s8] sm:$0xff]  ;;  %v285_v9 = vld [vmem:[#allocation7] sm:$0xff]  ;;  %p608_p4 = scmp.ne.s32.totalorder %s901_s21, 3 }
  0x50   : > { %631 = vmatpush3.xpose.msk.msra.mxu0 %vm296_vm1, %v288_v2  ;;  %v602_v10 = vld [vmem:[%s1124_s2] ss:$0 sm:$0xff] }
  0x51   : > { %632 = vmatprep.subr.mxu0 %v918_v3 }
  0x54   : > { %v386_v5 = vld [vmem:[#allocation3] sm:$0xff]  ;;  %633 = vmatpush3.xpose.msk.msra.mxu0 %vm296_vm1, %v287_v7  ;;  %v383_v13 = vld [vmem:[#allocation2] sm:$0xff] }
  0x55   : > { %v387_v6 = vmin.f32 %v386_v5, %v284_v4  ;;  %634 = vmatprep.subr.mxu0 %v918_v3 }
  0x57   : > { %388 = vst.msk [vmem:[#allocation3] sm:$0xff] %vm296_vm1, %v387_v6 }
  0x58   : > { %635 = vmatpush3.xpose.msk.msra.mxu0 %vm296_vm1, %v286_v8 }
  0x59   : > { %636 = vmatprep.subr.mxu0 %v918_v3 }
  0x5c   : > { %637 = vmatpush3.xpose.msk.msra.mxu0 %vm296_vm1, %v285_v9 }
  0x5f   : > { %639 = vmatmul.mubr.msk.f32.vlgmr.msra.gmra.mxu0 %vm296_vm1, %v284_v4 }
 0x11f   : > { %v378_v11 = vpop.f32.mrf.mxu0 }
 0x120   : > { %v379_v12 = vadd.f32 %v602_v10, %v378_v11 }
 0x121   : > { %v640_v14 = vpop.f32.mrf.mxu0 }
 0x122   : > { %v382_v15 = vmax.f32 %v379_v12, 0.0  ;;  %392 = sbr.rel (%p608_p4) target bundleno = 542 (0x21e), region = 60 }
 0x124   : > { %v384_v16 = vadd.f32 %v383_v13, %v382_v15 }
 0x126   : > { %385 = vst.msk [vmem:[#allocation2] sm:$0xff] %vm296_vm1, %v384_v16 }
 0x127   : > { %v398_v17 = vld [vmem:[#allocation9 + $0x18] sm:$0xff]  ;;  %v920_v18 = vmov 0.0   ;;  %vm921_vm3 = vmmov 0   ;;  %v397_v19 = vld [vmem:[#allocation9 + $0x10] sm:$0xff]  ;;  %v396_v20 = vld [vmem:[#allocation9 + $0x8] sm:$0xff] }
 0x128   : > { %641 = vmatprep.subr.mxu0 %v920_v18  ;;  %649 = vmatprep.mubr.msk.f32.mxu0 %vm921_vm3, %v920_v18  ;;  %v395_v22 = vld [vmem:[#allocation9] sm:$0xff]  ;;  %v497_v31 = vld [vmem:[#allocation3] sm:$0xff] }
 0x129   : > { %642 = vmatpush3.xpose.msk.msra.mxu0 %vm296_vm1, %v398_v17  ;;  %v609_v24 = vld [vmem:[%s1126_s4] ss:$0 sm:$0xff] }
 0x12a   : > { %643 = vmatprep.subr.mxu0 %v920_v18 }
 0x12d   : > { %644 = vmatpush3.xpose.msk.msra.mxu0 %vm296_vm1, %v397_v19  ;;  %v393_v21 = vld [vmem:[#allocation2] sm:$0xff] }
 0x12e   : > { %645 = vmatprep.subr.mxu0 %v920_v18  ;;  %v394_v23 = vmul.f32 0.25, %v393_v21 }
 0x131   : > { %646 = vmatpush3.xpose.msk.msra.mxu0 %vm296_vm1, %v396_v20 }
 0x132   : > { %647 = vmatprep.subr.mxu0 %v920_v18 }
 0x135   : > { %648 = vmatpush3.xpose.msk.msra.mxu0 %vm296_vm1, %v395_v22 }
 0x138   : > { %650 = vmatmul.mubr.msk.f32.vlgmr.msra.gmra.mxu0 %vm296_vm1, %v394_v23 }
 0x1f8   : > { %v487_v25 = vpop.f32.mrf.mxu0 }
 0x1f9   : > { %v488_v26 = vadd.f32 %v609_v24, %v487_v25 }
 0x1fa   : > { %v651_v27 = vpop.f32.mrf.mxu0 }
 0x1fb   : > { %v615_v28 = vmul.f32 -1.442695, %v488_v26 }
 0x1fd   : > { %743 = vpow2.f32 %v615_v28 }
 0x20a   : > { %v744_v29 = vpop.eup %743 }
 0x20b   : > { %v494_v30 = vadd.f32 1.0, %v744_v29 }
 0x20d   : > { %745 = vrcp.f32 %v494_v30 }
 0x21a   : > { %v746_v32 = vpop.eup %745 }
 0x21b   : > { %v498_v33 = vmul.f32 %v746_v32, %v497_v31 }
 0x21d   : > { %499 = vst.msk [vmem:[#allocation10] sm:$0xff] %vm296_vm1, %v498_v33 }
 0x21e PF: > { %p1089_p5 = scmp.eq.s32.totalorder %s590_s24, 3  ;;  %s922_s9 = smov [#allocation10]  }
 0x21f   : > { %s509_s10 = sshll.u32 %s922_s9, 4  ;;  %s510_s10 = int_to_ptr.vmem [resolvable:$true] %s509_s10 }
 0x220   : > { %s827_s11 = scalar_lea.vmem %s510_s10, 128  ;;  %p834_p9 = scmp.lt.s32.totalorder %s510_s10, %s510_s10 }
 0x221   : > { %p828_p3 = scmp.ne.s32.totalorder %s510_s10, %s827_s11  ;;  %p835_p10 = scmp.lt.s32.totalorder %s827_s11, %s827_s11 }
 0x223   : > { %p829_p7 = pnand %p828_p3, %p1089_p5  ;;  %p836_p12 = por %p835_p10, %p834_p9 }
 0x225   : > { %p830_p6 = pneg %p829_p7 }
 0x227   : > { %p837_p11 = pnand %p836_p12, %p830_p6 }
 0x229   : > { %840 = shalt.err (!%p837_p11)
}
 0x22a   : > { %663 = dma.vmem_to_hbm [thread:$0]  (%p1089_p5), %s510_s10, 128, %s1127_s5, [#allocation6]  }
 0x22b   : > { %884 = dma.done.wait (%p1089_p5), [#allocation6], 128  }
 0x22c   : > { %886 = vsyncadd (%p1089_p5), [#allocation6], 4294967168 }
 0x22d PF: > { %s20_s23 = sadd.s32 1, %s909_s23   ;;  %s1137_s18 = smov %s893_s19 }
 0x22e   : > { %p17_p1 = scmp.ge.s32.totalorder %s20_s23, 6   ;;  %s1138_s19 = smov %s897_s20 }
 0x22f   : > { %s1139_s20 = smov %s1040_s6  ;;  %s1140_s21 = smov %s905_s22 }
 0x230   : > { %s1141_s22 = smov %s1143_s16  ;;  %19 = sbr.rel (!%p17_p1) target bundleno = 6 (0x6), region = 94 }
 0x235   :  { %522 = vsyncpa [#allocation5], 1 }
 0x236   :  { %524 = vsyncpa [#allocation5 + $0x1], 1 }
 0x237   :  { %525 = vsyncpa [#allocation8], 1 }
 0x238   :  { %526 = vsyncpa [#allocation6], 1 }
 0x239   :  { %528 = vsyncpa [#allocation6 + $0x1], 1 }

// kernel: tpu_custom_call.1
= control target key start
LH: loop header
LB: loop body
LE: loop exit
PB: predicated region body
PF: predicated region fallthrough
CT: control target
= control target key end

     0   :  { %10 = vsyncpa [#allocation5], 0  ;;  %s1122_s0 = inlined_call_operand.hbm [shape: f32[4,8,32], index: 0, kind: input, shape index: {}]   ;;  %s1123_s1 = inlined_call_operand.hbm [shape: f32[32,32], index: 1, kind: input, shape index: {}]   ;;  %s1124_s2 = inlined_call_operand.vmem [shape: f32[1,32], index: 2, kind: input, shape index: {}]   ;;  %s1125_s3 = inlined_call_operand.hbm [shape: f32[32,32], index: 3, kind: input, shape index: {}]   ;;  %s1126_s4 = inlined_call_operand.vmem [shape: f32[1,32], index: 4, kind: input, shape index: {}]   ;;  %s1127_s5 = inlined_call_operand.hbm [shape: f32[8,32], index: 5, kind: output, shape index: {}]  }
   0x1   :  { %12 = vsyncpa [#allocation5 + $0x1], 0 }
   0x2   :  { %13 = vsyncpa [#allocation8], 0 }
   0x3   :  { %14 = vsyncpa [#allocation6], 0  ;;  %s953_s18 = smov 0   ;;  %s955_s19 = smov 0  }
   0x4   :  { %s957_s20 = smov 0   ;;  %s959_s21 = smov 0  }
   0x5   :  { %s961_s22 = smov 0   ;;  %s963_s23 = smov 0  }
   0x6 LB: > { %s590_s24 = sadd.s32 4294967295, %s909_s23   ;;  %p54_p0 = scmp.ne.s32.totalorder %s893_s19, %s889_s18  ;;  %s909_s23 = sphi %s963_s23, %s20_s23   ;;  %s905_s22 = sphi %s961_s22, %s1141_s22   ;;  %s901_s21 = sphi %s959_s21, %s1140_s21   ;;  %s897_s20 = sphi %s957_s20, %s1139_s20   ;;  %s893_s19 = sphi %s955_s19, %s1138_s19   ;;  %s889_s18 = sphi %s953_s18, %s1137_s18  }
   0x7   : > { %p985_p1 = scmp.eq.s32.totalorder %s590_s24, 0  ;;  %p591_p2 = scmp.ge.s32.totalorder %s909_s23, 1 }
   0x8   : > { %p175_p3 = scmp.lt.s32.totalorder %s909_s23, 5  ;;  %s911_s28 = smov [#allocation7]  }
   0x9   : > { %s1130_s25 = scalar_select %p985_p1, 1, 0 }
   0xa   : > { %p993_p4 = por %p985_p1, %p54_p0  ;;  %p997_p5 = pnand %p591_p2, %p175_p3 }
   0xb   : > { %s187_s29 = sshll.u32 %s911_s28, 4  ;;  %s912_s6 = smov [#allocation9]   ;;  %s188_s29 = int_to_ptr.vmem [resolvable:$true] %s187_s29 }
   0xc   : > { %p666_p6 = pneg %p997_p5  ;;  %s203_s7 = sshll.u32 %s912_s6, 4  ;;  %s204_s7 = int_to_ptr.vmem [resolvable:$true] %s203_s7 }
   0xd   : > { %s758_s8 = scalar_lea.vmem %s188_s29, 512  ;;  %p766_p12 = scmp.lt.s32.totalorder %s188_s29, %s188_s29 }
   0xe   : > { %p1005_p7 = pnand %p666_p6, %p985_p1  ;;  %p759_p9 = scmp.ne.s32.totalorder %s188_s29, %s758_s8 }
   0xf   : > { %p767_p13 = scmp.lt.s32.totalorder %s758_s8, %s758_s8 }
  0x10   : > { %p749_p8 = pneg %p1005_p7 }
  0x11   : > { %p768_p0 = por %p767_p13, %p766_p12 }
  0x12   : > { %p761_p10 = pnand %p759_p9, %p749_p8 }
  0x14   : > { %p762_p11 = pneg %p761_p10 }
  0x16   : > { %p769_p2 = pnand %p768_p0, %p762_p11 }
  0x18   : > { %772 = shalt.err (!%p769_p2)
}
  0x19   : > { %s913_s9 = smov 128   ;;  %s914_s10 = smov 8  }
  0x1a   : > { %669 = dma.hbm_to_vmem [thread:$0]  (!%p1005_p7), %s1123_s1, 512, %s188_s29, [#allocation8], %s913_s9, %s913_s9, %s914_s10  }
  0x1b   : > { %s784_s13 = scalar_lea.vmem %s204_s7, 512  ;;  %p792_p10 = scmp.lt.s32.totalorder %s204_s7, %s204_s7 }
  0x1c   : > { %p785_p3 = scmp.ne.s32.totalorder %s204_s7, %s784_s13  ;;  %p793_p1 = scmp.lt.s32.totalorder %s784_s13, %s784_s13 }
  0x1e   : > { %p787_p6 = pnand %p785_p3, %p749_p8  ;;  %p794_p12 = por %p793_p1, %p792_p10 }
  0x20   : > { %p788_p9 = pneg %p787_p6 }
  0x22   : > { %p795_p11 = pnand %p794_p12, %p788_p9 }
  0x24   : > { %798 = shalt.err (!%p795_p11)
}
  0x25   : > { %672 = dma.hbm_to_vmem [thread:$0]  (!%p1005_p7), %s1125_s3, 512, %s204_s7, [#allocation8], %s913_s9, %s913_s9, %s914_s10  }
  0x26   : > { %s29_s16 = sadd.s32 1, %s905_s22  ;;  %s41_s17 = sadd.s32 1, %s897_s20 }
  0x27   : > { %p30_p1 = scmp.ge.s32.totalorder %s29_s16, 4  ;;  %p48_p8 = scmp.ne.s32.totalorder %s897_s20, %s893_s19 }
  0x28   : > { %p49_p13 = scmp.eq.s32.totalorder %s909_s23, 0  ;;  %p679_p0 = scmp.lt.s32.totalorder %s909_s23, 4 }
  0x29   : > { %s1143_s16 = smov (%p30_p1, %s29_s16), 0  ;;  %s220_s18 = sand.u32 1, %s897_s20  }
  0x2a   : > { %p50_p2 = por %p49_p13, %p48_p8  ;;  %s36_s28 = ssub.s32 %s905_s22, %s1143_s16 }
  0x2b   : > { %p39_p3 = scmp.eq.s32.totalorder %s36_s28, 0  ;;  %s595_s29 = sshll.u32 %s220_s18, 3 }
  0x2c   : > { %s596_s30 = sshll.u32 %s905_s22, 7  ;;  %s224_s10 = scalar_lea.vmem [#allocation4], %s595_s29 }
  0x2d   : > { %s1040_s6 = scalar_select %p39_p3, %s897_s20, %s41_s17  }
  0x2e   : > { %s230_s9 = scalar_lea.hbm %s1122_s0, %s596_s30  ;;  %s232_s11 = sshll.u32 %s224_s10, 4  ;;  %s233_s11 = int_to_ptr.vmem [resolvable:$true] %s232_s11 }
  0x2f   : > { %p1047_p7 = pnand %p679_p0, %p50_p2  ;;  %s221_s13 = scalar_lea.sflag [#allocation5], %s220_s18 }
  0x30   : > { %s812_s14 = scalar_lea.vmem %s233_s11, 128  ;;  %s915_s15 = smov [#allocation4]  }
  0x31   : > { %p801_p6 = pneg %p1047_p7  ;;  %p813_p9 = scmp.ne.s32.totalorder %s233_s11, %s812_s14 }
  0x32   : > { %s817_s17 = sshll.u32 %s915_s15, 4  ;;  %s818_s17 = int_to_ptr.vmem [resolvable:$false] %s817_s17 }
  0x33   : > { %p815_p10 = pnand %p813_p9, %p801_p6  ;;  %s819_s28 = scalar_lea.vmem %s818_s17, 256 }
  0x34   : > { %p820_p11 = scmp.lt.s32.totalorder %s233_s11, %s818_s17  ;;  %p821_p1 = scmp.lt.s32.totalorder %s819_s28, %s812_s14 }
  0x35   : > { %p816_p12 = pneg %p815_p10 }
  0x36   : > { %p822_p8 = por %p821_p1, %p820_p11 }
  0x38   : > { %p823_p13 = pnand %p822_p8, %p816_p12 }
  0x3a   : > { %826 = shalt.err (!%p823_p13)
}
  0x3b   : > { %676 = dma.hbm_to_vmem [thread:$0]  (!%p1047_p7), %s230_s9, 128, %s233_s11, %s221_s13  }
  0x3c   : > { %241 = sbr.rel (%p997_p5) target bundleno = 557 (0x22d), region = 40  ;;  %s243_s18 = sand.u32 (!%p997_p5), 1, %s893_s19  }
  0x3d   : > { %s598_s29 = sshll.u32 (!%p997_p5), %s243_s18, 3  ;;  %s244_s30 = scalar_lea.sflag (!%p997_p5), [#allocation5], %s243_s18 }
  0x3e   : > { %s247_s8 = scalar_lea.vmem (!%p997_p5), [#allocation4], %s598_s29 }
  0x41   : > { %876 = dma.done.wait (%p993_p4), %s244_s30, 128  }
  0x42   : > { %878 = vsyncadd (%p993_p4), %s244_s30, 4294967168  ;;  %p1135_p0 = scmp.ne.s32.totalorder %s1130_s25, 0 }
  0x44   : > { %880 = dma.done.wait (%p1135_p0), [#allocation8], 1024  }
  0x45   : > { %882 = vsyncadd (%p1135_p0), [#allocation8], 4294966272  ;;  %p601_p2 = scmp.ne.s32.totalorder %s901_s21, 0 }
  0x47   : > { %280 = sbr.rel (%p601_p2) target bundleno = 78 (0x4e), region = 56 }
  0x4c   : > { %vm281_vm0 = vcmask 261120   ;;  %v916_v0 = vmov 0.0   ;;  %v917_v1 = vmov inf  }
  0x4d   : > { %282 = vst.msk [vmem:[#allocation2] sm:$0xff] %vm281_vm0, %v916_v0  ;;  %283 = vst.msk [vmem:[#allocation3] sm:$0xff] %vm281_vm0, %v917_v1 }
  0x4e PF: > { %v288_v2 = vld [vmem:[#allocation7 + $0x18] sm:$0xff]  ;;  %vm296_vm1 = vcmask 261120   ;;  %v918_v3 = vmov 0.0   ;;  %vm919_vm2 = vmmov 0   ;;  %v287_v7 = vld [vmem:[#allocation7 + $0x10] sm:$0xff]  ;;  %v286_v8 = vld [vmem:[#allocation7 + $0x8] sm:$0xff] }
  0x4f   : > { %630 = vmatprep.subr.mxu0 %v918_v3  ;;  %638 = vmatprep.mubr.msk.f32.mxu0 %vm919_vm2, %v918_v3  ;;  %v284_v4 = vld [vmem:[%s247_s8] sm:$0xff]  ;;  %v285_v9 = vld [vmem:[#allocation7] sm:$0xff]  ;;  %p608_p4 = scmp.ne.s32.totalorder %s901_s21, 3 }
  0x50   : > { %631 = vmatpush3.xpose.msk.msra.mxu0 %vm296_vm1, %v288_v2  ;;  %v602_v10 = vld [vmem:[%s1124_s2] ss:$0 sm:$0xff] }
  0x51   : > { %632 = vmatprep.subr.mxu0 %v918_v3 }
  0x54   : > { %v386_v5 = vld [vmem:[#allocation3] sm:$0xff]  ;;  %633 = vmatpush3.xpose.msk.msra.mxu0 %vm296_vm1, %v287_v7  ;;  %v383_v13 = vld [vmem:[#allocation2] sm:$0xff] }
  0x55   : > { %v387_v6 = vmin.f32 %v386_v5, %v284_v4  ;;  %634 = vmatprep.subr.mxu0 %v918_v3 }
  0x57   : > { %388 = vst.msk [vmem:[#allocation3] sm:$0xff] %vm296_vm1, %v387_v6 }
  0x58   : > { %635 = vmatpush3.xpose.msk.msra.mxu0 %vm296_vm1, %v286_v8 }
  0x59   : > { %636 = vmatprep.subr.mxu0 %v918_v3 }
  0x5c   : > { %637 = vmatpush3.xpose.msk.msra.mxu0 %vm296_vm1, %v285_v9 }
  0x5f   : > { %639 = vmatmul.mubr.msk.f32.vlgmr.msra.gmra.mxu0 %vm296_vm1, %v284_v4 }
 0x11f   : > { %v378_v11 = vpop.f32.mrf.mxu0 }
 0x120   : > { %v379_v12 = vadd.f32 %v602_v10, %v378_v11 }
 0x121   : > { %v640_v14 = vpop.f32.mrf.mxu0 }
 0x122   : > { %v382_v15 = vmax.f32 %v379_v12, 0.0  ;;  %392 = sbr.rel (%p608_p4) target bundleno = 542 (0x21e), region = 60 }
 0x124   : > { %v384_v16 = vadd.f32 %v383_v13, %v382_v15 }
 0x126   : > { %385 = vst.msk [vmem:[#allocation2] sm:$0xff] %vm296_vm1, %v384_v16 }
 0x127   : > { %v398_v17 = vld [vmem:[#allocation9 + $0x18] sm:$0xff]  ;;  %v920_v18 = vmov 0.0   ;;  %vm921_vm3 = vmmov 0   ;;  %v397_v19 = vld [vmem:[#allocation9 + $0x10] sm:$0xff]  ;;  %v396_v20 = vld [vmem:[#allocation9 + $0x8] sm:$0xff] }
 0x128   : > { %641 = vmatprep.subr.mxu0 %v920_v18  ;;  %649 = vmatprep.mubr.msk.f32.mxu0 %vm921_vm3, %v920_v18  ;;  %v395_v22 = vld [vmem:[#allocation9] sm:$0xff]  ;;  %v497_v31 = vld [vmem:[#allocation3] sm:$0xff] }
 0x129   : > { %642 = vmatpush3.xpose.msk.msra.mxu0 %vm296_vm1, %v398_v17  ;;  %v609_v24 = vld [vmem:[%s1126_s4] ss:$0 sm:$0xff] }
 0x12a   : > { %643 = vmatprep.subr.mxu0 %v920_v18 }
 0x12d   : > { %644 = vmatpush3.xpose.msk.msra.mxu0 %vm296_vm1, %v397_v19  ;;  %v393_v21 = vld [vmem:[#allocation2] sm:$0xff] }
 0x12e   : > { %645 = vmatprep.subr.mxu0 %v920_v18  ;;  %v394_v23 = vmul.f32 0.25, %v393_v21 }
 0x131   : > { %646 = vmatpush3.xpose.msk.msra.mxu0 %vm296_vm1, %v396_v20 }
 0x132   : > { %647 = vmatprep.subr.mxu0 %v920_v18 }
 0x135   : > { %648 = vmatpush3.xpose.msk.msra.mxu0 %vm296_vm1, %v395_v22 }
 0x138   : > { %650 = vmatmul.mubr.msk.f32.vlgmr.msra.gmra.mxu0 %vm296_vm1, %v394_v23 }
 0x1f8   : > { %v487_v25 = vpop.f32.mrf.mxu0 }
 0x1f9   : > { %v488_v26 = vadd.f32 %v609_v24, %v487_v25 }
 0x1fa   : > { %v651_v27 = vpop.f32.mrf.mxu0 }
 0x1fb   : > { %v615_v28 = vmul.f32 -1.442695, %v488_v26 }
 0x1fd   : > { %743 = vpow2.f32 %v615_v28 }
 0x20a   : > { %v744_v29 = vpop.eup %743 }
 0x20b   : > { %v494_v30 = vadd.f32 1.0, %v744_v29 }
 0x20d   : > { %745 = vrcp.f32 %v494_v30 }
 0x21a   : > { %v746_v32 = vpop.eup %745 }
 0x21b   : > { %v498_v33 = vmul.f32 %v746_v32, %v497_v31 }
 0x21d   : > { %499 = vst.msk [vmem:[#allocation10] sm:$0xff] %vm296_vm1, %v498_v33 }
 0x21e PF: > { %p1089_p5 = scmp.eq.s32.totalorder %s590_s24, 3  ;;  %s922_s9 = smov [#allocation10]  }
 0x21f   : > { %s509_s10 = sshll.u32 %s922_s9, 4  ;;  %s510_s10 = int_to_ptr.vmem [resolvable:$true] %s509_s10 }
 0x220   : > { %s827_s11 = scalar_lea.vmem %s510_s10, 128  ;;  %p834_p9 = scmp.lt.s32.totalorder %s510_s10, %s510_s10 }
 0x221   : > { %p828_p3 = scmp.ne.s32.totalorder %s510_s10, %s827_s11  ;;  %p835_p10 = scmp.lt.s32.totalorder %s827_s11, %s827_s11 }
 0x223   : > { %p829_p7 = pnand %p828_p3, %p1089_p5  ;;  %p836_p12 = por %p835_p10, %p834_p9 }
 0x225   : > { %p830_p6 = pneg %p829_p7 }
 0x227   : > { %p837_p11 = pnand %p836_p12, %p830_p6 }
 0x229   : > { %840 = shalt.err (!%p837_p11)
}
 0x22a   : > { %663 = dma.vmem_to_hbm [thread:$0]  (%p1089_p5), %s510_s10, 128, %s1127_s5, [#allocation6]  }
 0x22b   : > { %884 = dma.done.wait (%p1089_p5), [#allocation6], 128  }
 0x22c   : > { %886 = vsyncadd (%p1089_p5), [#allocation6], 4294967168 }
 0x22d PF: > { %s20_s23 = sadd.s32 1, %s909_s23   ;;  %s1137_s18 = smov %s893_s19 }
 0x22e   : > { %p17_p1 = scmp.ge.s32.totalorder %s20_s23, 6   ;;  %s1138_s19 = smov %s897_s20 }
 0x22f   : > { %s1139_s20 = smov %s1040_s6  ;;  %s1140_s21 = smov %s905_s22 }
 0x230   : > { %s1141_s22 = smov %s1143_s16  ;;  %19 = sbr.rel (!%p17_p1) target bundleno = 6 (0x6), region = 94 }
 0x235   :  { %522 = vsyncpa [#allocation5], 1 }
 0x236   :  { %524 = vsyncpa [#allocation5 + $0x1], 1 }
 0x237   :  { %525 = vsyncpa [#allocation8], 1 }
 0x238   :  { %526 = vsyncpa [#allocation6], 1 }
 0x239   :  { %528 = vsyncpa [#allocation6 + $0x1], 1 }

</bundles_post_ra>
